<compile_context>
chip_gen: v6e
topology: v6e:2x2x1
jax: 0.10.0
libtpu: 0.0.40
codegen_flags: <defaults>
</compile_context>

<pallas_src>
import functools

import jax
import jax.numpy as jnp
from jax.experimental import pallas as pl
from jax.experimental.pallas import tpu as pltpu

_VMEM_LIMIT_BYTES = 32 * 1024 * 1024    # <= scoped default on v7x, safe on v5e/v6e
_BLOCK_BYTES_TARGET = 2 * 1024 * 1024   # ~2 MiB blocks: past the HBM-roofline knee


def _largest_tile(n, quantum, max_tile):
    """Largest multiple of `quantum` that divides n and is <= max_tile.

    Falls back to n itself (full extent is always a legal block dim)."""
    best = None
    t = quantum
    cap = min(n, max_tile)
    while t <= cap:
        if n % t == 0:
            best = t
        t += quantum
    return best if best is not None else n


def _squeeze_fc_kernel(x_ref, w1t_ref, b1_ref, w2t_ref, b2_ref, s_ref, *, inv_hw):
    """Grid: (batch tiles, HW tiles).  s_ref is resident across the HW axis."""
    hi = pl.program_id(1)

    # Partial spatial sums accumulated in f32 (x may be bf16 -> upcast in reg).
    part = jnp.sum(x_ref[...].astype(jnp.float32), axis=2)          # (Bt, C)

    @pl.when(hi == 0)
    def _():
        s_ref[...] = jnp.zeros_like(s_ref)

    s_ref[...] += part

    @pl.when(hi == pl.num_programs(1) - 1)
    def _():
        squeeze = s_ref[...] * inv_hw                                # mean over true HW
        h = jnp.dot(squeeze, w1t_ref[...],
                    preferred_element_type=jnp.float32) + b1_ref[...]
        h = jnp.maximum(h, 0.0)
        z = jnp.dot(h, w2t_ref[...],
                    preferred_element_type=jnp.float32) + b2_ref[...]
        # numerically-safe sigmoid (exp only of non-positive arguments)
        ez = jnp.exp(-jnp.abs(z))
        s_ref[...] = jnp.where(z >= 0, 1.0 / (1.0 + ez), ez / (1.0 + ez))


def _scale_kernel(x_ref, s_ref, o_ref):
    """x_ref: (Rt, HWt) native dtype; s_ref: (Rt, 1) f32; o_ref: (Rt, HWt)."""
    x = x_ref[...].astype(jnp.float32)   # upcast in-register (v5e VPU has no bf16 path)
    o_ref[...] = (x * s_ref[...]).astype(o_ref.dtype)


def channel_se_layer(x, w1, b1, w2, b2):
    """SE forward. x: (B, C, H, W); w1: (Cr, C); b1: (Cr,); w2: (C, Cr); b2: (C,).

    Returns (B, C, H, W) in x.dtype."""
    B, C, H, W = x.shape
    Cr = w1.shape[0]
    HW = H * W
    itemsize = jnp.dtype(x.dtype).itemsize
    sublane = 8 * (4 // itemsize)        # rows per VMEM tile: 8 f32, 16 bf16

    # Lane-dense spatial axis: pad HW to a multiple of 128 (zero padding does
    # not change the sums; the mean divides by the true HW).
    HW_pad = ((HW + 127) // 128) * 128
    x_flat = x.reshape(B, C, HW)
    if HW_pad != HW:
        x_flat = jnp.pad(x_flat, ((0, 0), (0, 0), (0, HW_pad - HW)))

    # ---------------- pass 1: squeeze + FC -> channel scale ------------------
    w1t = jnp.transpose(w1).astype(jnp.float32)        # (C, Cr)
    w2t = jnp.transpose(w2).astype(jnp.float32)        # (Cr, C)
    b1_2d = b1.reshape(1, Cr).astype(jnp.float32)
    b2_2d = b2.reshape(1, C).astype(jnp.float32)

    hw_tile_sq = _largest_tile(HW_pad, 128, 2048)
    c_pad = ((C + sublane - 1) // sublane) * sublane
    bytes_per_b = c_pad * hw_tile_sq * itemsize
    cap_b = max(1, _BLOCK_BYTES_TARGET // bytes_per_b)
    # Bt must be a multiple of 8 or the full B (it lands on the sublane dim of
    # the (Bt, C) output block).
    bt = B if B <= cap_b else _largest_tile(B, 8, cap_b)

    squeeze_cost = pl.CostEstimate(
        flops=int(2 * B * C * HW_pad + 4 * B * C * Cr),
        transcendentals=int(B * C),
        bytes_accessed=int(B * C * HW_pad * itemsize + B * C * 4),
    )

    s = pl.pallas_call(
        functools.partial(_squeeze_fc_kernel, inv_hw=1.0 / HW),
        out_shape=jax.ShapeDtypeStruct((B, C), jnp.float32),
        grid_spec=pltpu.PrefetchScalarGridSpec(
            num_scalar_prefetch=0,
            grid=(B // bt, HW_pad // hw_tile_sq),
            in_specs=[
                pl.BlockSpec((bt, C, hw_tile_sq), lambda b, h: (b, 0, h)),
                pl.BlockSpec((C, Cr), lambda b, h: (0, 0)),
                pl.BlockSpec((1, Cr), lambda b, h: (0, 0)),
                pl.BlockSpec((Cr, C), lambda b, h: (0, 0)),
                pl.BlockSpec((1, C), lambda b, h: (0, 0)),
            ],
            out_specs=pl.BlockSpec((bt, C), lambda b, h: (b, 0)),
        ),
        compiler_params=pltpu.CompilerParams(
            dimension_semantics=("parallel", "arbitrary"),
            vmem_limit_bytes=_VMEM_LIMIT_BYTES),
        cost_estimate=squeeze_cost,
    )(x_flat, w1t, b1_2d, w2t, b2_2d)

    # ------------- pass 2: out = x * s, (B*C) folded onto sublanes ------------
    rows = B * C
    x2d = x_flat.reshape(rows, HW_pad)                 # free reshape (contiguous)
    s2d = s.reshape(rows, 1)

    hw_tile = _largest_tile(HW_pad, 128, 2048)
    max_rows = max(8, _BLOCK_BYTES_TARGET // (hw_tile * itemsize))
    row_tile = _largest_tile(rows, 8, max_rows)

    scale_cost = pl.CostEstimate(
        flops=int(rows * HW_pad),
        transcendentals=0,
        bytes_accessed=int(2 * rows * HW_pad * itemsize + rows * 4),
    )

    out2d = pl.pallas_call(
        _scale_kernel,
        out_shape=jax.ShapeDtypeStruct((rows, HW_pad), x.dtype),
        grid_spec=pltpu.PrefetchScalarGridSpec(
            num_scalar_prefetch=0,
            grid=(rows // row_tile, HW_pad // hw_tile),
            in_specs=[
                pl.BlockSpec((row_tile, hw_tile), lambda r, h: (r, h)),
                pl.BlockSpec((row_tile, 1), lambda r, h: (r, 0)),
            ],
            out_specs=pl.BlockSpec((row_tile, hw_tile), lambda r, h: (r, h)),
        ),
        compiler_params=pltpu.CompilerParams(
            dimension_semantics=("parallel", "parallel"),
            vmem_limit_bytes=_VMEM_LIMIT_BYTES),
        cost_estimate=scale_cost,
    )(x2d, s2d)

    if HW_pad != HW:
        out2d = out2d[:, :HW]
    return out2d.reshape(B, C, H, W)


if __name__ == "__main__":
    # Module config: num_channels=4, reduction_ratio=2 -> reduced channels = 2
    B, C, H, W = 2, 4, 16, 16
    Cr = C // 2

    key = jax.random.PRNGKey(0)
    kx, k1, k2, k3, k4 = jax.random.split(key, 5)

    x = jax.random.normal(kx, (B, C, H, W), dtype=jnp.float32)
    # nn.Linear(num_channels, num_channels_reduced): weight (Cr, C), bias (Cr,)
    w1 = jax.random.normal(k1, (Cr, C), dtype=jnp.float32) * 0.1
    b1 = jax.random.normal(k2, (Cr,), dtype=jnp.float32) * 0.1
    # nn.Linear(num_channels_reduced, num_channels): weight (C, Cr), bias (C,)
    w2 = jax.random.normal(k3, (C, Cr), dtype=jnp.float32) * 0.1
    b2 = jax.random.normal(k4, (C,), dtype=jnp.float32) * 0.1

    out = channel_se_layer(x, w1, b1, w2, b2)
    jax.block_until_ready(out)

    # Pure-JAX reference check (same math, outside Pallas)
    sq = x.reshape(B, C, -1).mean(axis=2)
    hid = jnp.maximum(sq @ w1.T + b1, 0.0)
    sc = jax.nn.sigmoid(hid @ w2.T + b2)
    ref = x * sc[:, :, None, None]
    assert out.dtype == x.dtype, "dtype not preserved"
    assert jnp.allclose(out, ref, atol=1e-5), "mismatch vs reference"

    print("KERNEL_OK")
</pallas_src>

<mosaic_0001>
module attributes {stable_mosaic.version = 11 : i64} {
  func.func @_squeeze_fc_kernel(%arg0: i32, %arg1: i32, %arg2: memref<2x4x256xf32, #tpu.memory_space<vmem>>, %arg3: memref<4x2xf32, #tpu.memory_space<vmem>>, %arg4: memref<1x2xf32, #tpu.memory_space<vmem>>, %arg5: memref<2x4xf32, #tpu.memory_space<vmem>>, %arg6: memref<1x4xf32, #tpu.memory_space<vmem>>, %arg7: memref<2x4xf32, #tpu.memory_space<vmem>>) attributes {dimension_semantics = [#tpu.dimension_semantics<parallel>, #tpu.dimension_semantics<arbitrary>], iteration_bounds = array<i64: 1, 1>, scalar_prefetch = 0 : i64, scratch_operands = 0 : i64, tpu.core_type = #tpu.core_type<tc>, window_params = [{transform_indices = @transform_0, window_bounds = array<i64: 2, 4, 256>}, {pipeline_mode = #tpu.pipeline_mode<synchronous>, transform_indices = @transform_1, window_bounds = array<i64: 4, 2>}, {pipeline_mode = #tpu.pipeline_mode<synchronous>, transform_indices = @transform_2, window_bounds = array<i64: 1, 2>}, {pipeline_mode = #tpu.pipeline_mode<synchronous>, transform_indices = @transform_3, window_bounds = array<i64: 2, 4>}, {pipeline_mode = #tpu.pipeline_mode<synchronous>, transform_indices = @transform_4, window_bounds = array<i64: 1, 4>}, {transform_indices = @transform_5, window_bounds = array<i64: 2, 4>}]} {
    %c0 = arith.constant 0 : index
    %c0_0 = arith.constant 0 : index
    %c0_1 = arith.constant 0 : index
    %0 = vector.load %arg2[%c0, %c0_0, %c0_1] : memref<2x4x256xf32, #tpu.memory_space<vmem>>, vector<2x4x256xf32>
    %cst = arith.constant dense<0.000000e+00> : vector<2x4xf32>
    %1 = vector.multi_reduction <add>, %0, %cst [2] : vector<2x4x256xf32> to vector<2x4xf32>
    %c0_i32 = arith.constant 0 : i32
    %2 = arith.cmpi eq, %arg1, %c0_i32 : i32
    %3 = arith.extui %2 : i1 to i32
    %c0_i32_2 = arith.constant 0 : i32
    %4 = arith.cmpi ne, %3, %c0_i32_2 : i32
    scf.if %4 {
      %cst_9 = arith.constant 0.000000e+00 : f32
      %11 = vector.broadcast %cst_9 : f32 to vector<2x4xf32>
      %c0_10 = arith.constant 0 : index
      %c0_11 = arith.constant 0 : index
      %12 = vector.load %arg7[%c0_10, %c0_11] : memref<2x4xf32, #tpu.memory_space<vmem>>, vector<2x4xf32>
      tpu.vector_store %arg7[%c0_10, %c0_11], %11 {strides = array<i32>} : memref<2x4xf32, #tpu.memory_space<vmem>>, vector<2x4xf32>,
    } else {
    }
    %c0_3 = arith.constant 0 : index
    %c0_4 = arith.constant 0 : index
    %5 = vector.load %arg7[%c0_3, %c0_4] : memref<2x4xf32, #tpu.memory_space<vmem>>, vector<2x4xf32>
    %6 = arith.addf %5, %1 : vector<2x4xf32>
    %c0_5 = arith.constant 0 : index
    %c0_6 = arith.constant 0 : index
    %7 = vector.load %arg7[%c0_5, %c0_6] : memref<2x4xf32, #tpu.memory_space<vmem>>, vector<2x4xf32>
    tpu.vector_store %arg7[%c0_5, %c0_6], %6 {strides = array<i32>} : memref<2x4xf32, #tpu.memory_space<vmem>>, vector<2x4xf32>,
    %c0_i32_7 = arith.constant 0 : i32
    %8 = arith.cmpi eq, %arg1, %c0_i32_7 : i32
    %9 = arith.extui %8 : i1 to i32
    %c0_i32_8 = arith.constant 0 : i32
    %10 = arith.cmpi ne, %9, %c0_i32_8 : i32
    scf.if %10 {
      %c0_9 = arith.constant 0 : index
      %c0_10 = arith.constant 0 : index
      %11 = vector.load %arg7[%c0_9, %c0_10] : memref<2x4xf32, #tpu.memory_space<vmem>>, vector<2x4xf32>
      %cst_11 = arith.constant 3.906250e-03 : f32
      %12 = vector.broadcast %cst_11 : f32 to vector<2x4xf32>
      %13 = arith.mulf %11, %12 : vector<2x4xf32>
      %c0_12 = arith.constant 0 : index
      %c0_13 = arith.constant 0 : index
      %14 = vector.load %arg3[%c0_12, %c0_13] : memref<4x2xf32, #tpu.memory_space<vmem>>, vector<4x2xf32>
      %cst_14 = arith.constant dense<0.000000e+00> : vector<2x2xf32>
      %15 = tpu.matmul %13, %14, %cst_14 {dimension_numbers = #tpu.dot_dimension_numbers<[1], [0], [0], [1], [0, 0, 1, 1], [], []>} : vector<2x4xf32>, vector<4x2xf32>, vector<2x2xf32> -> vector<2x2xf32>
      %c0_15 = arith.constant 0 : index
      %c0_16 = arith.constant 0 : index
      %16 = vector.load %arg4[%c0_15, %c0_16] : memref<1x2xf32, #tpu.memory_space<vmem>>, vector<1x2xf32>
      %17 = vector.broadcast %16 : vector<1x2xf32> to vector<2x2xf32>
      %18 = arith.addf %15, %17 : vector<2x2xf32>
      %cst_17 = arith.constant 0.000000e+00 : f32
      %19 = vector.broadcast %cst_17 : f32 to vector<2x2xf32>
      %20 = arith.maximumf %18, %19 : vector<2x2xf32>
      %c0_18 = arith.constant 0 : index
      %c0_19 = arith.constant 0 : index
      %21 = vector.load %arg5[%c0_18, %c0_19] : memref<2x4xf32, #tpu.memory_space<vmem>>, vector<2x4xf32>
      %cst_20 = arith.constant dense<0.000000e+00> : vector<2x4xf32>
      %22 = tpu.matmul %20, %21, %cst_20 {dimension_numbers = #tpu.dot_dimension_numbers<[1], [0], [0], [1], [0, 0, 1, 1], [], []>} : vector<2x2xf32>, vector<2x4xf32>, vector<2x4xf32> -> vector<2x4xf32>
      %c0_21 = arith.constant 0 : index
      %c0_22 = arith.constant 0 : index
      %23 = vector.load %arg6[%c0_21, %c0_22] : memref<1x4xf32, #tpu.memory_space<vmem>>, vector<1x4xf32>
      %24 = vector.broadcast %23 : vector<1x4xf32> to vector<2x4xf32>
      %25 = arith.addf %22, %24 : vector<2x4xf32>
      %26 = math.absf %25 : vector<2x4xf32>
      %cst_23 = arith.constant 0.000000e+00 : f32
      %27 = vector.broadcast %cst_23 : f32 to vector<2x4xf32>
      %28 = arith.subf %27, %26 : vector<2x4xf32>
      %29 = math.exp %28 : vector<2x4xf32>
      %cst_24 = arith.constant 0.000000e+00 : f32
      %30 = vector.broadcast %cst_24 : f32 to vector<2x4xf32>
      %31 = arith.cmpf oge, %25, %30 : vector<2x4xf32>
      %cst_25 = arith.constant 1.000000e+00 : f32
      %32 = vector.broadcast %cst_25 : f32 to vector<2x4xf32>
      %33 = arith.addf %32, %29 : vector<2x4xf32>
      %cst_26 = arith.constant 1.000000e+00 : f32
      %34 = vector.broadcast %cst_26 : f32 to vector<2x4xf32>
      %35 = arith.divf %34, %33 : vector<2x4xf32>
      %cst_27 = arith.constant 1.000000e+00 : f32
      %36 = vector.broadcast %cst_27 : f32 to vector<2x4xf32>
      %37 = arith.addf %36, %29 : vector<2x4xf32>
      %38 = arith.divf %29, %37 : vector<2x4xf32>
      %39 = arith.select %31, %35, %38 : vector<2x4xi1>, vector<2x4xf32>
      %c0_28 = arith.constant 0 : index
      %c0_29 = arith.constant 0 : index
      %40 = vector.load %arg7[%c0_28, %c0_29] : memref<2x4xf32, #tpu.memory_space<vmem>>, vector<2x4xf32>
      tpu.vector_store %arg7[%c0_28, %c0_29], %39 {strides = array<i32>} : memref<2x4xf32, #tpu.memory_space<vmem>>, vector<2x4xf32>,
    } else {
    }
    return
  }
  func.func @transform_0(%arg0: i32, %arg1: i32) -> (i32, i32, i32) {
    %c0_i32 = arith.constant 0 : i32
    %c0_i32_0 = arith.constant 0 : i32
    return %arg0, %c0_i32, %arg1 : i32, i32, i32
  }
  func.func @transform_1(%arg0: i32, %arg1: i32) -> (i32, i32) {
    %c0_i32 = arith.constant 0 : i32
    %c0_i32_0 = arith.constant 0 : i32
    %c0_i32_1 = arith.constant 0 : i32
    return %c0_i32, %c0_i32_0 : i32, i32
  }
  func.func @transform_2(%arg0: i32, %arg1: i32) -> (i32, i32) {
    %c0_i32 = arith.constant 0 : i32
    %c0_i32_0 = arith.constant 0 : i32
    %c0_i32_1 = arith.constant 0 : i32
    return %c0_i32, %c0_i32_0 : i32, i32
  }
  func.func @transform_3(%arg0: i32, %arg1: i32) -> (i32, i32) {
    %c0_i32 = arith.constant 0 : i32
    %c0_i32_0 = arith.constant 0 : i32
    %c0_i32_1 = arith.constant 0 : i32
    return %c0_i32, %c0_i32_0 : i32, i32
  }
  func.func @transform_4(%arg0: i32, %arg1: i32) -> (i32, i32) {
    %c0_i32 = arith.constant 0 : i32
    %c0_i32_0 = arith.constant 0 : i32
    %c0_i32_1 = arith.constant 0 : i32
    return %c0_i32, %c0_i32_0 : i32, i32
  }
  func.func @transform_5(%arg0: i32, %arg1: i32) -> (i32, i32) {
    %c0_i32 = arith.constant 0 : i32
    %c0_i32_0 = arith.constant 0 : i32
    return %arg0, %c0_i32 : i32, i32
  }
}

</mosaic_0001>

<bundles_post_ra>
// kernel: tpu_custom_call.1
= control target key start
LH: loop header
LB: loop body
LE: loop exit
PB: predicated region body
PF: predicated region fallthrough
CT: control target
= control target key end

     0   :  { %10 = vsyncpa [#allocation3], 0  ;;  %s420_s0 = inlined_call_operand.hbm [shape: f32[2,4,256], index: 0, kind: input, shape index: {}]   ;;  %s421_s1 = inlined_call_operand.vmem [shape: f32[4,2], index: 1, kind: input, shape index: {}]   ;;  %s422_s2 = inlined_call_operand.vmem [shape: f32[1,2], index: 2, kind: input, shape index: {}]   ;;  %s423_s3 = inlined_call_operand.vmem [shape: f32[2,4], index: 3, kind: input, shape index: {}]   ;;  %s424_s4 = inlined_call_operand.vmem [shape: f32[1,4], index: 4, kind: input, shape index: {}]   ;;  %s425_s5 = inlined_call_operand.hbm [shape: f32[2,4], index: 5, kind: output, shape index: {}]  }
   0x1   :  { %11 = vsyncpa [#allocation4], 0  ;;  %s358_s18 = smov [#allocation2]  }
   0x2   :  { %s17_s19 = sshll.u32 %s358_s18, 4  ;;  %s18_s19 = int_to_ptr.vmem [resolvable:$true] %s17_s19 }
   0x3   :  { %s322_s20 = scalar_lea.vmem %s18_s19, 256  ;;  %p327_p1 = scmp.lt.s32.totalorder %s18_s19, %s18_s19 }
   0x4   :  { %p323_p0 = scmp.ne.s32.totalorder %s18_s19, %s322_s20  ;;  %p328_p2 = scmp.lt.s32.totalorder %s322_s20, %s322_s20 }
   0x6   :  { %p329_p3 = por %p328_p2, %p327_p1 }
   0x8   :  { %p330_p4 = pnand %p329_p3, %p323_p0 }
   0xa   :  { %333 = shalt.err (!%p330_p4)
}
   0xb   :  { %s359_s21 = smov 128   ;;  %s360_s22 = smov 8  }
   0xc   :  { %23 = dma.hbm_to_vmem [thread:$0]  %s420_s0, 256, %s18_s19, [#allocation3], %s359_s21, %s359_s21, %s360_s22  }
   0xd   :  { %354 = dma.done.wait [#allocation3], 256  }
   0xe   :  { %355 = vsyncadd [#allocation3], 4294967040  ;;  %vm43_vm0 = vcmask 1043456   ;;  %v35_v0 = vld [vmem:[#allocation2] sm:$0xff]  ;;  %v36_v1 = vld [vmem:[#allocation2 + $0x8] sm:$0xff]  ;;  %vm58_vm1 = vcmask 25600   ;;  %v63_v12 = vlaneseq }
   0xf   :  { %v39_v2 = vcombine.high %v35_v0, %v35_v0  ;;  %v44_v3 = vsel %vm43_vm0, %v35_v0, 0.0  ;;  %v40_v4 = vcombine.high %v36_v1, %v36_v1  ;;  %v49_v6 = vsel %vm43_vm0, %v36_v1, 0.0  ;;  %v84_v11 = vld [vmem:[%s421_s1] sm:$0xf] }
  0x10   :  { %v361_v10 = vmov 0.0   ;;  %vm362_vm2 = vmmov 0   ;;  %v64_v13 = vand.u32 127, %v63_v12  ;;  %v66_v14 = vshrl.u32 %v63_v12, 7  ;;  %v170_v25 = vld [vmem:[%s423_s3] sm:$0x3] }
  0x11   :  { %v45_v5 = vsel %vm43_vm0, %v39_v2, 0.0  ;;  %v50_v7 = vsel %vm43_vm0, %v40_v4, 0.0  ;;  %59 = vst.msk [vmem:[#allocation5] sm:$0x3] %vm58_vm1, %v361_v10  ;;  %292 = vmatprep.subr.mxu0 %v361_v10  ;;  %297 = vmatprep.subr.mxu1 %v361_v10  ;;  %vm73_vm3 = vcmask 1041409   ;;  %vm92_vm4 = vcmask 31744  }
  0x12   :  { %v46_v8 = vadd.f32 %v45_v5, %v44_v3  ;;  %v51_v9 = vadd.f32 %v50_v7, %v49_v6  ;;  %293 = vmatpush3.msk.msra.mxu0 %vm43_vm0, %v84_v11  ;;  %294 = vmatprep.mubr.msk.f32.mxu0 %vm362_vm2, %v361_v10  ;;  %v67_v16 = vsub.s32 %v64_v13, %v66_v14  ;;  %vm182_vm5 = vcmask 1041408   ;;  %v282_v26 = vld [vmem:[%s422_s2] ss:$0 sm:$0xff]  ;;  %s363_s2 = smov [#allocation5]  }
  0x13   :  { %299 = vmatprep.mubr.msk.f32.mxu1 %vm362_vm2, %v361_v10  ;;  %298 = vmatpush3.msk.msra.mxu1 %vm182_vm5, %v170_v25  ;;  %vm178_vm6 = vcmask 15360   ;;  %v285_v31 = vld [vmem:[%s424_s4] ss:$0 sm:$0xff]  ;;  %s273_s3 = sshll.u32 %s363_s2, 4  ;;  %s274_s3 = int_to_ptr.vmem [resolvable:$true] %s273_s3 }
  0x14   :  { %47 = vadd.xlane.f32.xlu0 %v46_v8  ;;  %s334_s4 = scalar_lea.vmem %s274_s3, 32  ;;  %p339_p6 = scmp.lt.s32.totalorder %s274_s3, %s274_s3 }
  0x15   :  { %p335_p5 = scmp.ne.s32.totalorder %s274_s3, %s334_s4  ;;  %p340_p7 = scmp.lt.s32.totalorder %s334_s4, %s334_s4 }
  0x17   :  { %p341_p8 = por %p340_p7, %p339_p6 }
  0x18   :  { %52 = vadd.xlane.f32.xlu0 %v51_v9  ;;  %v60_v20 = vld [vmem:[#allocation5] sm:$0x3] }
  0x19   :  { %p342_p9 = pnand %p341_p8, %p335_p5 }
  0x9d   :  { %v48_v15 = vpop.xlane.xlu0 %47 }
  0x9e   :  { %v68_v18 = vrot.slane %v48_v15, %v67_v16 }
  0xa1   :  { %v53_v17 = vpop.xlane.xlu0 %52 }
  0xa2   :  { %v72_v19 = vrot.slane %v53_v17, %v67_v16 }
  0xa4   :  { %v74_v21 = vsel %vm73_vm3, %v72_v19, %v68_v18 }
  0xa5   :  { %v76_v22 = vadd.f32 %v74_v21, %v60_v20 }
  0xa7   :  { %78 = vst.msk [vmem:[#allocation5] sm:$0x3] %vm58_vm1, %v76_v22 }
  0xae   :  { %v82_v23 = vld [vmem:[#allocation5] sm:$0x3] }
  0xaf   :  { %v83_v24 = vmul.f32 0.00390625, %v82_v23 }
  0xb1   :  { %295 = vmatmul.mubr.msk.f32.vlgmr.msra.gmra.mxu0 %vm92_vm4, %v83_v24 }
 0x171   :  { %v165_v27 = vpop.f32.mrf.mxu0 }
 0x172   :  { %v166_v28 = vadd.f32 %v282_v26, %v165_v27 }
 0x173   :  { %v296_v29 = vpop.f32.mrf.mxu0 }
 0x174   :  { %v169_v30 = vmax.f32 %v166_v28, 0.0 }
 0x176   :  { %300 = vmatmul.mubr.msk.f32.vlgmr.msra.gmra.mxu1 %vm178_vm6, %v169_v30 }
 0x236   :  { %v252_v32 = vpop.f32.mrf.mxu1 }
 0x237   :  { %v253_v33 = vadd.f32 %v285_v31, %v252_v32 }
 0x238   :  { %v301_v34 = vpop.f32.mrf.mxu1 }
 0x239   :  { %v256_v35 = vand.u32 2147483647, %v253_v33  ;;  %vm260_vm7 = vcmp.ge.f32.partialorder %v253_v33, 0.0 }
 0x23b   :  { %v257_v36 = vsub.f32 0.0, %v256_v35 }
 0x23d   :  { %v258_v37 = vmul.f32 1.442695, %v257_v36 }
 0x23f   :  { %310 = vpow2.f32 %v258_v37 }
 0x24c   :  { %v311_v38 = vpop.eup %310 }
 0x24d   :  { %v261_v39 = vadd.f32 1.0, %v311_v38 }
 0x24f   :  { %312 = vrcp.f32 %v261_v39 }
 0x25c   :  { %v313_v40 = vpop.eup %312 }
 0x25d   :  { %v264_v41 = vmul.f32 %v313_v40, %v311_v38 }
 0x25f   :  { %v265_v42 = vsel %vm260_vm7, %v313_v40, %v264_v41 }
 0x260   :  { %266 = vst.msk [vmem:[#allocation5] sm:$0x3] %vm58_vm1, %v265_v42 }
 0x261   :  { %345 = shalt.err (!%p342_p9)
}
 0x262   :  { %276 = dma.vmem_to_hbm [thread:$0]  %s274_s3, 32, %s425_s5, [#allocation4]  }
 0x263   :  { %356 = dma.done.wait [#allocation4], 32  }
 0x264   :  { %357 = vsyncadd [#allocation4], 4294967264 }
 0x265   :  { %280 = vsyncpa [#allocation3], 1 }
 0x266   :  { %281 = vsyncpa [#allocation4], 1 }

</bundles_post_ra>
